<compile_context>
chip_gen: v7x
topology: tpu7x:2x2x1
jax: 0.10.0
libtpu: 0.0.40
codegen_flags: <defaults>
</compile_context>

<pallas_src>
import functools

import jax
import jax.numpy as jnp
from jax.experimental import pallas as pl
from jax.experimental.pallas import tpu as pltpu

LANE = 128

_A_DBUF_BUDGET = 8 * 1024 * 1024    # bytes for the double-buffered int8 A slab (2*tm*n*1B)
_VMEM_LIMIT = 40 * 1024 * 1024      # explicit scoped-VMEM limit: > v5e's 16 MiB default,
                                    # << v7x's 64 MiB-per-TensorCore physical VMEM


def _resident_spec(block_shape, index_map):
    """BlockSpec for a constant-index operand: single-buffer it (its block never changes,
    so double-buffering only wastes VMEM).  Falls back if pipeline_mode is unavailable."""
    try:
        return pl.BlockSpec(block_shape, index_map, pipeline_mode=pl.Buffered(1))
    except TypeError:  # older JAX without pipeline_mode kwarg
        return pl.BlockSpec(block_shape, index_map)


# ---------------------------------------------------------------------------
# Kernel 1: per-node projections (one pass over X does both linear maps).
#   x_ref   [tm, Fin]  bf16
#   wl_ref  [Fin, Fout] bf16   lin_l weight (aggregated-neighbor path)
#   wr_ref  [Fin, Fout] bf16   lin_r weight (root/self path)
#   b_ref   [1, Fout]  f32     lin_l bias
#   xwl_ref [tm, Fout] bf16    X @ W_l            (feeds the aggregation MXU)
#   xwrb_ref[tm, Fout] f32     X @ W_r + b        (added after aggregation)
# ---------------------------------------------------------------------------
def _project_kernel(x_ref, wl_ref, wr_ref, b_ref, xwl_ref, xwrb_ref):
    x = x_ref[...]
    xwl_ref[...] = jnp.dot(x, wl_ref[...],
                           preferred_element_type=jnp.float32).astype(jnp.bfloat16)
    xwrb_ref[...] = jnp.dot(x, wr_ref[...],
                            preferred_element_type=jnp.float32) + b_ref[...]


# ---------------------------------------------------------------------------
# Kernel 2: mean-aggregation + combine over one row slab.
#   a_ref     [tm, N]    int8  unnormalized incoming-edge counts for this slab's nodes
#   invdeg_ref[tm, 1]    f32   1 / in-degree (0 rows handled: counts are all-zero)
#   xwl_ref   [N, Fout]  bf16  projected features of ALL nodes (resident, single-buffered)
#   xwrb_ref  [tm, Fout] f32   root path + bias for this slab
#   out_ref   [tm, Fout]
# ---------------------------------------------------------------------------
def _sage_aggregate_kernel(a_ref, invdeg_ref, xwl_ref, xwrb_ref, out_ref, *, apply_relu):
    # int8 edge counts -> bf16 (exact for counts < 128); explicit i8->i32->f32->bf16 chain.
    counts = a_ref[...].astype(jnp.int32).astype(jnp.float32).astype(jnp.bfloat16)
    # (1/deg) * sum_j counts[i,j] * (x_j @ W_l)  ==  lin_l(mean_j x_j)   by linearity.
    aggr = jnp.dot(counts, xwl_ref[...], preferred_element_type=jnp.float32)
    y = aggr * invdeg_ref[...] + xwrb_ref[...]
    if apply_relu:
        y = jnp.maximum(y, 0.0)
    out_ref[...] = y.astype(out_ref.dtype)


# ---------------------------------------------------------------------------
# Tile-size selection.
# ---------------------------------------------------------------------------
def _pick_tm(n):
    """Row-slab size for the aggregation kernel.

    * double-buffered int8 A slab (2 * tm * n bytes) stays within _A_DBUF_BUDGET,
    * tm never exceeds the row extent,
    * mid/large graphs get >= 2 slabs so the "parallel" grid axis feeds both TCs on v7x,
    * multiples of 256 (MXU-friendly on v6e/v7x) when large, else 32 (int8 sublane packing).
    Tiny graphs use one full-extent block (always layout-legal; grid overhead dominates).
    """
    if n <= 256:
        return n
    tm = _A_DBUF_BUDGET // (2 * n)       # 2 buffers * tm * n * 1 B <= budget
    tm = min(tm, n, 2048)
    tm = min(tm, -(-n // 2))             # ceil(n/2): at least 2 row slabs
    if tm >= 256:
        tm = (tm // 256) * 256
    else:
        tm = max(32, (tm // 32) * 32)
    return tm


def _pick_proj_tm(n):
    # Projection traffic is tiny (N*F bytes); keep it simple.
    return n if n <= 1024 else 1024


# ---------------------------------------------------------------------------
# pallas_call wrappers.
# ---------------------------------------------------------------------------
def _project(x, wl, wr, b, *, tm=None):
    n, f_in = x.shape
    f_out = wl.shape[1]
    if tm is None:
        tm = _pick_proj_tm(n)
    return pl.pallas_call(
        _project_kernel,
        out_shape=(jax.ShapeDtypeStruct((n, f_out), jnp.bfloat16),
                   jax.ShapeDtypeStruct((n, f_out), jnp.float32)),
        grid=(pl.cdiv(n, tm),),
        in_specs=[
            pl.BlockSpec((tm, f_in), lambda i: (i, 0)),        # node-feature row slab
            _resident_spec((f_in, f_out), lambda i: (0, 0)),   # W_l (constant)
            _resident_spec((f_in, f_out), lambda i: (0, 0)),   # W_r (constant)
            _resident_spec((1, f_out), lambda i: (0, 0)),      # bias (constant)
        ],
        out_specs=(pl.BlockSpec((tm, f_out), lambda i: (i, 0)),
                   pl.BlockSpec((tm, f_out), lambda i: (i, 0))),
        compiler_params=pltpu.CompilerParams(
            dimension_semantics=("parallel",),
            vmem_limit_bytes=_VMEM_LIMIT),
    )(x, wl, wr, b)


def _aggregate(a_counts, inv_deg, xwl, xwrb, *, apply_relu, out_dtype, tm=None):
    n = a_counts.shape[0]
    f_out = xwl.shape[1]
    if tm is None:
        tm = _pick_tm(n)
    kernel = functools.partial(_sage_aggregate_kernel, apply_relu=apply_relu)
    return pl.pallas_call(
        kernel,
        out_shape=jax.ShapeDtypeStruct((n, f_out), out_dtype),
        grid=(pl.cdiv(n, tm),),
        in_specs=[
            pl.BlockSpec((tm, n), lambda i: (i, 0)),           # int8 A slab (the HBM stream)
            pl.BlockSpec((tm, 1), lambda i: (i, 0)),           # 1/deg for this slab
            _resident_spec((n, f_out), lambda i: (0, 0)),      # X@W_l for ALL nodes, resident
            pl.BlockSpec((tm, f_out), lambda i: (i, 0)),       # X@W_r + b for this slab
        ],
        out_specs=pl.BlockSpec((tm, f_out), lambda i: (i, 0)),
        compiler_params=pltpu.CompilerParams(
            dimension_semantics=("parallel",),                 # shard row slabs across TCs
            vmem_limit_bytes=_VMEM_LIMIT),
    )(a_counts, inv_deg, xwl, xwrb)


# ---------------------------------------------------------------------------
# One-time graph / parameter preprocessing (reused every forward on a static graph).
# ---------------------------------------------------------------------------
def precompute_adjacency(edge_index, num_nodes):
    """Dense incoming-edge counts (int8) + f32 inverse in-degree, built once per graph.

    int8 counts halve the dominant HBM stream vs bf16 and (with the f32 1/deg applied
    post-GEMM) are exactly the PyG scatter-mean weights.  Assumes per-pair edge
    multiplicity < 128.
    """
    # TODO(synk): for very large / dynamic graphs, replace the dense N x N matrix with an
    # in-kernel sparse gather built from scalar-prefetched CSR data (PrefetchScalarGridSpec
    # + memory_space=pl.ANY + make_async_copy), which costs O(E) HBM bytes instead of O(N^2).
    src = edge_index[0]
    dst = edge_index[1]
    counts = jnp.zeros((num_nodes, num_nodes), jnp.float32).at[dst, src].add(1.0)
    deg = jnp.sum(counts, axis=1, keepdims=True)
    inv_deg = jnp.where(deg > 0.0, 1.0 / jnp.maximum(deg, 1.0), 0.0).astype(jnp.float32)
    return counts.astype(jnp.int8), inv_deg


def prepare_params(params):
    """Cast weights to bf16; pad the final layer to 128 output lanes so the last store is
    lane-dense (sliced back to out_channels in the wrapper)."""
    out_c = params["w2l"].shape[1]
    assert out_c <= LANE
    pad = LANE - out_c
    return {
        "w1l": params["w1l"].astype(jnp.bfloat16),
        "w1r": params["w1r"].astype(jnp.bfloat16),
        "b1": params["b1"].astype(jnp.float32),
        "w2l": jnp.pad(params["w2l"], ((0, 0), (0, pad))).astype(jnp.bfloat16),
        "w2r": jnp.pad(params["w2r"], ((0, 0), (0, pad))).astype(jnp.bfloat16),
        "b2": jnp.pad(params["b2"], ((0, 0), (0, pad))).astype(jnp.float32),
        "out_c": out_c,
    }


def graphsage_forward(x, adj_counts, inv_deg, prep):
    """x: [N, F] f32;  adj_counts/inv_deg from precompute_adjacency;  prep from prepare_params."""
    x_bf = x.astype(jnp.bfloat16)

    # Layer 1: project, aggregate, ReLU.  h1 stored bf16 (feeds layer-2 MXU directly).
    xwl1, xwrb1 = _project(x_bf, prep["w1l"], prep["w1r"], prep["b1"])
    h1 = _aggregate(adj_counts, inv_deg, xwl1, xwrb1,
                    apply_relu=True, out_dtype=jnp.bfloat16)

    # Layer 2: project (128-lane padded), aggregate, no activation.
    xwl2, xwrb2 = _project(h1, prep["w2l"], prep["w2r"], prep["b2"])
    y_pad = _aggregate(adj_counts, inv_deg, xwl2, xwrb2,
                       apply_relu=False, out_dtype=jnp.float32)
    return y_pad[:, : prep["out_c"]]


def init_params(key, num_features, hidden, out_channels):
    """Deterministic synthetic parameters, stored [in, out] (torch weight transposed)."""
    ks = jax.random.split(key, 6)
    s1 = 1.0 / jnp.sqrt(num_features)
    s2 = 1.0 / jnp.sqrt(hidden)
    return {
        # layer 1: lin_l (aggregated path, with bias), lin_r (root path, no bias)
        "w1l": jax.random.uniform(ks[0], (num_features, hidden), jnp.float32, -s1, s1),
        "b1":  jax.random.uniform(ks[1], (1, hidden), jnp.float32, -s1, s1),
        "w1r": jax.random.uniform(ks[2], (num_features, hidden), jnp.float32, -s1, s1),
        # layer 2
        "w2l": jax.random.uniform(ks[3], (hidden, out_channels), jnp.float32, -s2, s2),
        "b2":  jax.random.uniform(ks[4], (1, out_channels), jnp.float32, -s2, s2),
        "w2r": jax.random.uniform(ks[5], (hidden, out_channels), jnp.float32, -s2, s2),
    }


if __name__ == "__main__":
    key = jax.random.PRNGKey(0)
    k_x, k_e, k_p = jax.random.split(key, 3)

    num_nodes = 16
    num_features = 16
    num_edges = 40
    hidden = 32
    out_channels = 2

    x = jax.random.normal(k_x, (num_nodes, num_features), dtype=jnp.float32)
    edge_index = jax.random.randint(k_e, (2, num_edges), 0, num_nodes, dtype=jnp.int32)

    params = init_params(k_p, num_features, hidden, out_channels)

    # One-time graph / parameter preprocessing (cache these for a static graph).
    adj_counts, inv_deg = precompute_adjacency(edge_index, num_nodes)
    prep = prepare_params(params)

    out = graphsage_forward(x, adj_counts, inv_deg, prep)
    out = jax.block_until_ready(out)

    assert out.shape == (num_nodes, out_channels)
    assert bool(jnp.all(jnp.isfinite(out)))
    print("KERNEL_OK")
</pallas_src>

<mosaic_0001>
module attributes {stable_mosaic.version = 11 : i64} {
  func.func @_project_kernel(%arg0: i32, %arg1: memref<16x16xbf16, #tpu.memory_space<vmem>>, %arg2: memref<16x32xbf16, #tpu.memory_space<vmem>>, %arg3: memref<16x32xbf16, #tpu.memory_space<vmem>>, %arg4: memref<1x32xf32, #tpu.memory_space<vmem>>, %arg5: memref<16x32xbf16, #tpu.memory_space<vmem>>, %arg6: memref<16x32xf32, #tpu.memory_space<vmem>>) attributes {dimension_semantics = [#tpu.dimension_semantics<parallel>], iteration_bounds = array<i64: 1>, scalar_prefetch = 0 : i64, scratch_operands = 0 : i64, tpu.core_type = #tpu.core_type<tc>, window_params = [{transform_indices = @transform_0, window_bounds = array<i64: 16, 16>}, {pipeline_mode = #tpu.pipeline_mode<synchronous>, transform_indices = @transform_1, window_bounds = array<i64: 16, 32>}, {pipeline_mode = #tpu.pipeline_mode<synchronous>, transform_indices = @transform_2, window_bounds = array<i64: 16, 32>}, {pipeline_mode = #tpu.pipeline_mode<synchronous>, transform_indices = @transform_3, window_bounds = array<i64: 1, 32>}, {transform_indices = @transform_4, window_bounds = array<i64: 16, 32>}, {transform_indices = @transform_5, window_bounds = array<i64: 16, 32>}]} {
    %c0 = arith.constant 0 : index
    %c0_0 = arith.constant 0 : index
    %0 = vector.load %arg1[%c0, %c0_0] : memref<16x16xbf16, #tpu.memory_space<vmem>>, vector<16x16xbf16>
    %c0_1 = arith.constant 0 : index
    %c0_2 = arith.constant 0 : index
    %1 = vector.load %arg2[%c0_1, %c0_2] : memref<16x32xbf16, #tpu.memory_space<vmem>>, vector<16x32xbf16>
    %cst = arith.constant dense<0.000000e+00> : vector<16x32xf32>
    %2 = tpu.matmul %0, %1, %cst {dimension_numbers = #tpu.dot_dimension_numbers<[1], [0], [0], [1], [0, 0, 1, 1], [], []>} : vector<16x16xbf16>, vector<16x32xbf16>, vector<16x32xf32> -> vector<16x32xf32>
    %3 = arith.truncf %2 : vector<16x32xf32> to vector<16x32xbf16>
    %c0_3 = arith.constant 0 : index
    %c0_4 = arith.constant 0 : index
    %4 = vector.load %arg5[%c0_3, %c0_4] : memref<16x32xbf16, #tpu.memory_space<vmem>>, vector<16x32xbf16>
    tpu.vector_store %arg5[%c0_3, %c0_4], %3 {strides = array<i32>} : memref<16x32xbf16, #tpu.memory_space<vmem>>, vector<16x32xbf16>,
    %c0_5 = arith.constant 0 : index
    %c0_6 = arith.constant 0 : index
    %5 = vector.load %arg3[%c0_5, %c0_6] : memref<16x32xbf16, #tpu.memory_space<vmem>>, vector<16x32xbf16>
    %cst_7 = arith.constant dense<0.000000e+00> : vector<16x32xf32>
    %6 = tpu.matmul %0, %5, %cst_7 {dimension_numbers = #tpu.dot_dimension_numbers<[1], [0], [0], [1], [0, 0, 1, 1], [], []>} : vector<16x16xbf16>, vector<16x32xbf16>, vector<16x32xf32> -> vector<16x32xf32>
    %c0_8 = arith.constant 0 : index
    %c0_9 = arith.constant 0 : index
    %7 = vector.load %arg4[%c0_8, %c0_9] : memref<1x32xf32, #tpu.memory_space<vmem>>, vector<1x32xf32>
    %8 = vector.broadcast %7 : vector<1x32xf32> to vector<16x32xf32>
    %9 = arith.addf %6, %8 : vector<16x32xf32>
    %c0_10 = arith.constant 0 : index
    %c0_11 = arith.constant 0 : index
    %10 = vector.load %arg6[%c0_10, %c0_11] : memref<16x32xf32, #tpu.memory_space<vmem>>, vector<16x32xf32>
    tpu.vector_store %arg6[%c0_10, %c0_11], %9 {strides = array<i32>} : memref<16x32xf32, #tpu.memory_space<vmem>>, vector<16x32xf32>,
    return
  }
  func.func @transform_0(%arg0: i32) -> (i32, i32) {
    %c0_i32 = arith.constant 0 : i32
    %c0_i32_0 = arith.constant 0 : i32
    return %arg0, %c0_i32 : i32, i32
  }
  func.func @transform_1(%arg0: i32) -> (i32, i32) {
    %c0_i32 = arith.constant 0 : i32
    %c0_i32_0 = arith.constant 0 : i32
    %c0_i32_1 = arith.constant 0 : i32
    return %c0_i32, %c0_i32_0 : i32, i32
  }
  func.func @transform_2(%arg0: i32) -> (i32, i32) {
    %c0_i32 = arith.constant 0 : i32
    %c0_i32_0 = arith.constant 0 : i32
    %c0_i32_1 = arith.constant 0 : i32
    return %c0_i32, %c0_i32_0 : i32, i32
  }
  func.func @transform_3(%arg0: i32) -> (i32, i32) {
    %c0_i32 = arith.constant 0 : i32
    %c0_i32_0 = arith.constant 0 : i32
    %c0_i32_1 = arith.constant 0 : i32
    return %c0_i32, %c0_i32_0 : i32, i32
  }
  func.func @transform_4(%arg0: i32) -> (i32, i32) {
    %c0_i32 = arith.constant 0 : i32
    %c0_i32_0 = arith.constant 0 : i32
    return %arg0, %c0_i32 : i32, i32
  }
  func.func @transform_5(%arg0: i32) -> (i32, i32) {
    %c0_i32 = arith.constant 0 : i32
    %c0_i32_0 = arith.constant 0 : i32
    return %arg0, %c0_i32 : i32, i32
  }
}

</mosaic_0001>

<bundles_post_ra>
// kernel: tpu_custom_call.1
= control target key start
LH: loop header
LB: loop body
LE: loop exit
PB: predicated region body
PF: predicated region fallthrough
CT: control target
= control target key end

     0   :  { %11 = vsyncpa [#allocation3], 0  ;;  %s517_s0 = inlined_call_operand.hbm [shape: bf16[16,16], index: 0, kind: input, shape index: {}]   ;;  %s518_s1 = inlined_call_operand.hbm [shape: bf16[16,32], index: 1, kind: input, shape index: {}]   ;;  %s519_s2 = inlined_call_operand.hbm [shape: bf16[16,32], index: 2, kind: input, shape index: {}]   ;;  %s520_s3 = inlined_call_operand.vmem [shape: f32[1,32], index: 3, kind: input, shape index: {}]   ;;  %s521_s4 = inlined_call_operand.hbm [shape: bf16[16,32], index: 4, kind: output, shape index: {0}]   ;;  %s522_s5 = inlined_call_operand.hbm [shape: f32[16,32], index: 5, kind: output, shape index: {1}]  }
   0x1   :  { %12 = vsyncpa [#allocation6], 0 }
   0x2   :  { %13 = vsyncpa [#allocation4], 0 }
   0x3   :  { %14 = vsyncpa [#allocation10], 0  ;;  %s385_s18 = smov [#allocation5]   ;;  %s386_s20 = smov [#allocation2]  }
   0x4   :  { %s32_s19 = sshll.u32 %s385_s18, 4  ;;  %s20_s21 = sshll.u32 %s386_s20, 4  ;;  %s33_s19 = int_to_ptr.vmem [resolvable:$true] %s32_s19  ;;  %s426_s21 = int_to_ptr.vmem [resolvable:$true] %s20_s21 }
   0x5   :  { %s267_s24 = scalar_lea.hbm %s518_s1, 128 }
   0x6   :  { %p268_p0 = scmp.ne.s32.totalorder %s518_s1, %s267_s24  ;;  %p271_p1 = scmp.lt.u32.totalorder %s267_s24, %s518_s1 }
   0x8   :  { %p273_p2 = pnand %p271_p1, %p268_p0 }
   0xa   :  { %276 = shalt.err (!%p273_p2)
}
   0xb   :  { %s277_s29 = scalar_lea.vmem %s33_s19, 128  ;;  %p282_p4 = scmp.lt.s32.totalorder %s33_s19, %s33_s19 }
   0xc   :  { %p278_p3 = scmp.ne.s32.totalorder %s33_s19, %s277_s29  ;;  %p283_p5 = scmp.lt.s32.totalorder %s277_s29, %s277_s29 }
   0xe   :  { %p284_p6 = por %p283_p5, %p282_p4 }
  0x10   :  { %p285_p7 = pnand %p284_p6, %p278_p3 }
  0x12   :  { %288 = shalt.err (!%p285_p7)
}
  0x13   :  { %s387_s30 = smov 64   ;;  %s388_s6 = smov 4  }
  0x14   :  { %38 = dma.hbm_to_vmem [thread:$0]  %s518_s1, 128, %s33_s19, [#allocation6], %s387_s30, %s387_s30, %s388_s6  }
  0x15   :  { %s289_s11 = scalar_lea.hbm %s517_s0, 128 }
  0x16   :  { %p290_p8 = scmp.ne.s32.totalorder %s517_s0, %s289_s11  ;;  %p293_p9 = scmp.lt.u32.totalorder %s289_s11, %s517_s0 }
  0x18   :  { %p295_p10 = pnand %p293_p9, %p290_p8 }
  0x1a   :  { %298 = shalt.err (!%p295_p10)
}
  0x1b   :  { %s299_s16 = scalar_lea.vmem %s426_s21, 128  ;;  %p304_p12 = scmp.lt.s32.totalorder %s426_s21, %s426_s21 }
  0x1c   :  { %p300_p11 = scmp.ne.s32.totalorder %s426_s21, %s299_s16  ;;  %p305_p13 = scmp.lt.s32.totalorder %s299_s16, %s299_s16 }
  0x1e   :  { %p306_p0 = por %p305_p13, %p304_p12 }
  0x20   :  { %p307_p1 = pnand %p306_p0, %p300_p11 }
  0x22   :  { %310 = shalt.err (!%p307_p1)
}
  0x23   :  { %26 = dma.hbm_to_vmem [thread:$0]  %s517_s0, 128, %s426_s21, [#allocation3], %s387_s30, %s387_s30, %s388_s6  }
  0x24   :  { %s389_s18 = smov [#allocation7]   ;;  %s311_s23 = scalar_lea.hbm %s519_s2, 128 }
  0x25   :  { %s44_s19 = sshll.u32 %s389_s18, 4  ;;  %p312_p2 = scmp.ne.s32.totalorder %s519_s2, %s311_s23  ;;  %s45_s19 = int_to_ptr.vmem [resolvable:$true] %s44_s19 }
  0x26   :  { %p315_p3 = scmp.lt.u32.totalorder %s311_s23, %s519_s2 }
  0x28   :  { %p317_p4 = pnand %p315_p3, %p312_p2 }
  0x2a   :  { %320 = shalt.err (!%p317_p4)
}
  0x2b   :  { %s321_s28 = scalar_lea.vmem %s45_s19, 128  ;;  %p326_p6 = scmp.lt.s32.totalorder %s45_s19, %s45_s19 }
  0x2c   :  { %p322_p5 = scmp.ne.s32.totalorder %s45_s19, %s321_s28  ;;  %p327_p7 = scmp.lt.s32.totalorder %s321_s28, %s321_s28 }
  0x2e   :  { %p328_p8 = por %p327_p7, %p326_p6 }
  0x30   :  { %p329_p9 = pnand %p328_p8, %p322_p5 }
  0x32   :  { %332 = shalt.err (!%p329_p9)
}
  0x33   :  { %50 = dma.hbm_to_vmem [thread:$0]  %s519_s2, 128, %s45_s19, [#allocation6], %s387_s30, %s387_s30, %s388_s6  }
  0x34   :  { %377 = dma.done.wait [#allocation3], 128  }
  0x35   :  { %378 = vsyncadd [#allocation3], 4294967168 }
  0x36   :  { %379 = dma.done.wait [#allocation6], 256  }
  0x37   :  { %380 = vsyncadd [#allocation6], 4294967040  ;;  %v390_v0 = vmov 0.0   ;;  %vm391_vm0 = vmmov 0   ;;  %v264_v1 = vld [vmem:[#allocation5] sm:$0xff]   ;;  %v265_v2 = vld [vmem:[#allocation7] sm:$0xff]  }
  0x38   :  { %241 = vmatprep.subr.bf16.mxu0 %v390_v0  ;;  %247 = vmatprep.subr.bf16.mxu1 %v390_v0  ;;  %v266_v3 = vld [vmem:[#allocation2] sm:$0xff]   ;;  %vm78_vm1 = vcmask 130048   ;;  %vm131_vm2 = vcmask 257024   ;;  %s392_s7 = smov [#allocation8]   ;;  %s393_s9 = smov [#allocation9]   ;;  %vm190_vm3 = vcmask 261120  }
  0x39   :  { %243 = vmatprep.mubr.msk.bf16.mxu0 %vm391_vm0, %v390_v0  ;;  %249 = vmatprep.mubr.msk.bf16.mxu1 %vm391_vm0, %v390_v0  ;;  %v232_v4 = vld [vmem:[%s520_s3] ss:$0 sm:$0xff]  ;;  %s198_s8 = sshll.u32 %s392_s7, 4  ;;  %s210_s10 = sshll.u32 %s393_s9, 4  ;;  %s199_s8 = int_to_ptr.vmem [resolvable:$true] %s198_s8  ;;  %s482_s10 = int_to_ptr.vmem [resolvable:$true] %s210_s10 }
  0x3a   :  { %242 = vmatpush3.bf16.msra.mxu0 %v264_v1  ;;  %248 = vmatpush3.bf16.msra.mxu1 %v265_v2  ;;  %s333_s3 = scalar_lea.vmem %s199_s8, 128  ;;  %p338_p11 = scmp.lt.s32.totalorder %s199_s8, %s199_s8 }
  0x3b   :  { %p334_p10 = scmp.ne.s32.totalorder %s199_s8, %s333_s3  ;;  %p339_p12 = scmp.lt.s32.totalorder %s333_s3, %s333_s3 }
  0x3d   :  { %244 = vmatmul.mubr.msk.bf16.vlgmr.msra.gmra.mrb[0].mxu0 %vm78_vm1, %v266_v3  ;;  %250 = vmatmul.mubr.msk.bf16.vlgmr.msra.gmra.mrb[0].mxu1 %vm78_vm1, %v266_v3  ;;  %p340_p13 = por %p339_p12, %p338_p11 }
  0x3f   :  { %p341_p0 = pnand %p340_p13, %p334_p10 }
 0x110   :  { %v116_v5 = vpop.f32.mrb[0].mxu0  ;;  %v183_v7 = vpop.f32.mrb[0].mxu1 }
 0x111   :  { %v235_v6 = vpack.c.bf16 %v116_v5, %v116_v5  ;;  %v245_v8 = vpop.f32.mrb[1].mxu0  ;;  %v184_v9 = vadd.f32 %v232_v4, %v183_v7  ;;  %v251_v10 = vpop.f32.mrb[1].mxu1 }
 0x112   :  { %v119_v11 = vpop.f32.mrb[2].mxu0  ;;  %v186_v13 = vpop.f32.mrb[2].mxu1 }
 0x113   :  { %v236_v12 = vpack.c.bf16 %v119_v11, %v119_v11  ;;  %v246_v14 = vpop.f32.mrb[3].mxu0  ;;  %132 = vst.msk [vmem:[#allocation8] sm:$0xf] %vm131_vm2, %v235_v6  ;;  %v187_v15 = vadd.f32 %v232_v4, %v186_v13  ;;  %v252_v16 = vpop.f32.mrb[3].mxu1 }
 0x114   :  { %191 = vst.msk [vmem:[#allocation9] sm:$0xff] %vm190_vm3, %v184_v9 }
 0x115   :  { %133 = vst.msk [vmem:[#allocation8 + $0x4] sm:$0xf] %vm131_vm2, %v236_v12 }
 0x116   :  { %192 = vst.msk [vmem:[#allocation9 + $0x8] sm:$0xff] %vm190_vm3, %v187_v15 }
 0x117   :  { %344 = shalt.err (!%p341_p0)
}
 0x118   :  { %s345_s13 = scalar_lea.hbm %s521_s4, 128 }
 0x119   :  { %p346_p1 = scmp.ne.s32.totalorder %s521_s4, %s345_s13  ;;  %p349_p2 = scmp.lt.u32.totalorder %s345_s13, %s521_s4 }
 0x11b   :  { %p351_p3 = pnand %p349_p2, %p346_p1 }
 0x11d   :  { %354 = shalt.err (!%p351_p3)
}
 0x11e   :  { %204 = dma.vmem_to_hbm [thread:$0]  %s199_s8, 128, %s521_s4, [#allocation4], %s387_s30, %s387_s30, %s388_s6  }
 0x11f   :  { %s355_s19 = scalar_lea.vmem %s482_s10, 256  ;;  %p360_p5 = scmp.lt.s32.totalorder %s482_s10, %s482_s10 }
 0x120   :  { %p356_p4 = scmp.ne.s32.totalorder %s482_s10, %s355_s19  ;;  %p361_p6 = scmp.lt.s32.totalorder %s355_s19, %s355_s19 }
 0x122   :  { %p362_p7 = por %p361_p6, %p360_p5 }
 0x124   :  { %p363_p8 = pnand %p362_p7, %p356_p4 }
 0x126   :  { %366 = shalt.err (!%p363_p8)
}
 0x127   :  { %s367_s23 = scalar_lea.hbm %s522_s5, 256 }
 0x128   :  { %p368_p9 = scmp.ne.s32.totalorder %s522_s5, %s367_s23  ;;  %p371_p10 = scmp.lt.u32.totalorder %s367_s23, %s522_s5 }
 0x12a   :  { %p373_p11 = pnand %p371_p10, %p368_p9 }
 0x12c   :  { %376 = shalt.err (!%p373_p11)
}
 0x12d   :  { %s394_s4 = smov 128   ;;  %s395_s30 = smov 8  }
 0x12e   :  { %216 = dma.vmem_to_hbm [thread:$0]  %s482_s10, 256, %s522_s5, [#allocation10], %s394_s4, %s394_s4, %s395_s30  }
 0x12f   :  { %381 = dma.done.wait [#allocation4], 128  }
 0x130   :  { %382 = vsyncadd [#allocation4], 4294967168 }
 0x131   :  { %383 = dma.done.wait [#allocation10], 256  }
 0x132   :  { %384 = vsyncadd [#allocation10], 4294967040 }
 0x133   :  { %223 = vsyncpa [#allocation3], 1 }
 0x134   :  { %224 = vsyncpa [#allocation6], 1 }
 0x135   :  { %225 = vsyncpa [#allocation4], 1 }
 0x136   :  { %226 = vsyncpa [#allocation10], 1 }

</bundles_post_ra>
